<compile_context>
chip_gen: v6e
topology: v6e:2x2x1
jax: 0.10.0
libtpu: 0.0.40
codegen_flags: <defaults>
</compile_context>

<pallas_src>
import functools

import jax
import jax.numpy as jnp
from jax.experimental import pallas as pl
from jax.experimental.pallas import tpu as pltpu

_LANE = 128
_SUBLANE = 8


def _l1_l2_sums_kernel(x_ref, r_ref, abs_ref, sq_ref, *,
                       tm, bpc, rows, needs_mask):
    p = pl.program_id(0)   # core / parallel axis
    i = pl.program_id(1)   # reduction axis

    # Zero this core's resident accumulator on its first reduction step.
    @pl.when(i == 0)
    def _():
        abs_ref[...] = jnp.zeros_like(abs_ref)
        sq_ref[...] = jnp.zeros_like(sq_ref)

    # In-kernel upcast: operands arrive in native dtype; all math and
    # accumulation is f32 (safe on v5e, which lacks bf16 VALU).
    d = r_ref[...].astype(jnp.float32) - x_ref[...].astype(jnp.float32)

    if needs_mask:
        # Mask rows past the true extent (ragged last tile / clamped blocks).
        blk = p * bpc + i
        row = jax.lax.broadcasted_iota(jnp.int32, d.shape, 0) + blk * tm
        d = jnp.where(row < rows, d, 0.0)

    # (tm,128) -> (8,128) partials: pure whole-vreg VPU adds, dense (8,128)
    # accumulator load/add/store each step (no sublane XLU reduce here).
    d3 = d.reshape(tm // _SUBLANE, _SUBLANE, _LANE)
    abs_ref[...] += jnp.sum(jnp.abs(d3), axis=0)
    sq_ref[...] += jnp.sum(d3 * d3, axis=0)


def _fused_l1_l2_sums(inputs, reconstructions):
    """Returns (sum(|r - x|), sum((r - x)^2)) over all elements, fused."""
    assert inputs.shape == reconstructions.shape
    n = inputs.size

    xf = inputs.reshape(-1)            # free reshape; native dtype preserved
    rf = reconstructions.reshape(-1)

    zero = jnp.float32(0.0)
    tail_abs, tail_sq = zero, zero
    n_main = (n // _LANE) * _LANE
    if n_main != n:
        # Sub-lane remainder (< 128 elements): tiny jnp epilogue.
        # TODO(synk): the aligned-prefix slice below may copy when n is not a
        # multiple of 128; typical image tensors take the zero-copy path.
        dt = rf[n_main:].astype(jnp.float32) - xf[n_main:].astype(jnp.float32)
        tail_abs = jnp.sum(jnp.abs(dt))
        tail_sq = jnp.sum(dt * dt)
        if n_main == 0:
            return tail_abs, tail_sq
        xf = jax.lax.slice(xf, (0,), (n_main,))
        rf = jax.lax.slice(rf, (0,), (n_main,))

    rows = n_main // _LANE
    x2 = xf.reshape(rows, _LANE)       # free reshape (n_main % 128 == 0)
    r2 = rf.reshape(rows, _LANE)

    itemsizes = (x2.dtype.itemsize, r2.dtype.itemsize)
    # Block sublane multiple for the most tightly packed operand dtype.
    sub = max({4: 8, 2: 16, 1: 32}.get(min(itemsizes), 8), _SUBLANE)

    # Tile target: ~8 MiB of double-buffered input VMEM (2 operands x 2 bufs);
    # fits v5e's 16 MiB and v6e/v7x's 32 MiB default scoped-VMEM limits while
    # hiding the ~0.35 us per-grid-step overhead (tm=4096 f32, 8192 bf16).
    vmem_budget = 8 * 1024 * 1024
    tm = int(vmem_budget // (2 * _LANE * sum(itemsizes)))
    tm = max(512, min(8192, tm))
    tm_eff = min(tm, -(-rows // sub) * sub)       # sublane-aligned, <= target

    num_blocks = -(-rows // tm_eff)               # ceil-div
    n_cores = 2 if num_blocks >= 2 else 1         # v7x megacore split
    bpc = -(-num_blocks // n_cores)               # blocks per core
    needs_mask = (n_cores * bpc * tm_eff != rows)
    clamp = (n_cores * bpc != num_blocks)         # trailing blocks past array

    def in_map(p, i):
        b = p * bpc + i
        if clamp:  # keep block index in-bounds; masked to zero in-kernel
            b = jnp.minimum(b, num_blocks - 1)
        return (b, 0)

    def out_map(p, i):
        return (p, 0)

    kernel = functools.partial(_l1_l2_sums_kernel, tm=tm_eff, bpc=bpc,
                               rows=rows, needs_mask=needs_mask)

    abs_part, sq_part = pl.pallas_call(
        kernel,
        out_shape=(
            jax.ShapeDtypeStruct((n_cores * _SUBLANE, _LANE), jnp.float32),
            jax.ShapeDtypeStruct((n_cores * _SUBLANE, _LANE), jnp.float32),
        ),
        grid_spec=pltpu.PrefetchScalarGridSpec(
            num_scalar_prefetch=0,
            grid=(n_cores, bpc),
            in_specs=[
                pl.BlockSpec((tm_eff, _LANE), in_map),
                pl.BlockSpec((tm_eff, _LANE), in_map),
            ],
            out_specs=(
                pl.BlockSpec((_SUBLANE, _LANE), out_map),
                pl.BlockSpec((_SUBLANE, _LANE), out_map),
            ),
        ),
        compiler_params=pltpu.CompilerParams(
            dimension_semantics=("parallel", "arbitrary")),
        cost_estimate=pl.CostEstimate(
            flops=5 * n_main,
            transcendentals=0,
            bytes_accessed=(n_main * sum(itemsizes)
                            + 2 * n_cores * _SUBLANE * _LANE * 4),
        ),
    )(x2, r2)

    return jnp.sum(abs_part) + tail_abs, jnp.sum(sq_part) + tail_sq


def vqlpips_forward(codebook_loss, inputs, reconstructions, *,
                    codebook_weight=1.0, loglaplace_weight=1.0,
                    loggaussian_weight=1.0, perceptual_weight=1.0,
                    split="train"):
    """JAX/Pallas equivalent of VQLPIPS.forward (perceptual term -> 0.0)."""
    n = inputs.size
    s_abs, s_sq = _fused_l1_l2_sums(inputs, reconstructions)
    loglaplace_loss = s_abs / n
    loggaussian_loss = s_sq / n
    # TODO(synk): pretrained-VGG LPIPS perceptual loss not reproducible here.
    perceptual_loss = jnp.float32(0.0)

    nll_loss = (loglaplace_weight * loglaplace_loss
                + loggaussian_weight * loggaussian_loss
                + perceptual_weight * perceptual_loss)
    codebook_loss = jnp.asarray(codebook_loss, jnp.float32)
    loss = nll_loss + codebook_weight * codebook_loss

    log = {
        f"{split}/total_loss": loss,
        f"{split}/quant_loss": codebook_loss,
        f"{split}/rec_loss": nll_loss,
        f"{split}/loglaplace_loss": loglaplace_loss,
        f"{split}/loggaussian_loss": loggaussian_loss,
        f"{split}/perceptual_loss": perceptual_loss,
    }
    return loss, log


def _vqlpips_ref(codebook_loss, inputs, reconstructions):
    d = reconstructions.astype(jnp.float32) - inputs.astype(jnp.float32)
    ll = jnp.mean(jnp.abs(d))
    lg = jnp.mean(d * d)
    nll = ll + lg          # perceptual term is 0.0 (see TODO above)
    return nll + codebook_loss, ll, lg


if __name__ == "__main__":
    key = jax.random.PRNGKey(0)
    k_in, k_rec, k_cb = jax.random.split(key, 3)

    batch, channels, spatial = 2, 3, 16
    inputs = jax.random.uniform(k_in, (batch, channels, spatial, spatial),
                                dtype=jnp.float32)
    reconstructions = jax.random.uniform(
        k_rec, (batch, channels, spatial, spatial), dtype=jnp.float32)
    codebook_loss = jax.random.uniform(k_cb, (), dtype=jnp.float32)

    loss, log = vqlpips_forward(codebook_loss, inputs, reconstructions,
                                split="train")
    jax.block_until_ready(loss)

    loss_ref, ll_ref, lg_ref = _vqlpips_ref(codebook_loss, inputs,
                                            reconstructions)
    assert jnp.allclose(loss, loss_ref, atol=1e-5, rtol=1e-5), "loss mismatch"
    assert jnp.allclose(log["train/loglaplace_loss"], ll_ref,
                        atol=1e-5, rtol=1e-5), "loglaplace mismatch"
    assert jnp.allclose(log["train/loggaussian_loss"], lg_ref,
                        atol=1e-5, rtol=1e-5), "loggaussian mismatch"

    print("KERNEL_OK")
</pallas_src>

<mosaic_0001>
module attributes {stable_mosaic.version = 11 : i64} {
  func.func @_l1_l2_sums_kernel(%arg0: i32, %arg1: i32, %arg2: memref<16x128xf32, #tpu.memory_space<vmem>>, %arg3: memref<16x128xf32, #tpu.memory_space<vmem>>, %arg4: memref<8x128xf32, #tpu.memory_space<vmem>>, %arg5: memref<8x128xf32, #tpu.memory_space<vmem>>) attributes {dimension_semantics = [#tpu.dimension_semantics<parallel>, #tpu.dimension_semantics<arbitrary>], iteration_bounds = array<i64: 1, 1>, scalar_prefetch = 0 : i64, scratch_operands = 0 : i64, tpu.core_type = #tpu.core_type<tc>, window_params = [{transform_indices = @transform_0, window_bounds = array<i64: 16, 128>}, {transform_indices = @transform_1, window_bounds = array<i64: 16, 128>}, {transform_indices = @transform_2, window_bounds = array<i64: 8, 128>}, {transform_indices = @transform_3, window_bounds = array<i64: 8, 128>}]} {
    %c0_i32 = arith.constant 0 : i32
    %0 = arith.cmpi eq, %arg1, %c0_i32 : i32
    %1 = arith.extui %0 : i1 to i32
    %c0_i32_0 = arith.constant 0 : i32
    %2 = arith.cmpi ne, %1, %c0_i32_0 : i32
    scf.if %2 {
      %cst_14 = arith.constant 0.000000e+00 : f32
      %27 = vector.broadcast %cst_14 : f32 to vector<8x128xf32>
      %c0_15 = arith.constant 0 : index
      %c0_16 = arith.constant 0 : index
      %28 = vector.load %arg4[%c0_15, %c0_16] : memref<8x128xf32, #tpu.memory_space<vmem>>, vector<8x128xf32>
      tpu.vector_store %arg4[%c0_15, %c0_16], %27 {strides = array<i32>} : memref<8x128xf32, #tpu.memory_space<vmem>>, vector<8x128xf32>,
      %cst_17 = arith.constant 0.000000e+00 : f32
      %29 = vector.broadcast %cst_17 : f32 to vector<8x128xf32>
      %c0_18 = arith.constant 0 : index
      %c0_19 = arith.constant 0 : index
      %30 = vector.load %arg5[%c0_18, %c0_19] : memref<8x128xf32, #tpu.memory_space<vmem>>, vector<8x128xf32>
      tpu.vector_store %arg5[%c0_18, %c0_19], %29 {strides = array<i32>} : memref<8x128xf32, #tpu.memory_space<vmem>>, vector<8x128xf32>,
    } else {
    }
    %c0 = arith.constant 0 : index
    %c0_1 = arith.constant 0 : index
    %3 = vector.load %arg3[%c0, %c0_1] : memref<16x128xf32, #tpu.memory_space<vmem>>, vector<16x128xf32>
    %c0_2 = arith.constant 0 : index
    %c0_3 = arith.constant 0 : index
    %4 = vector.load %arg2[%c0_2, %c0_3] : memref<16x128xf32, #tpu.memory_space<vmem>>, vector<16x128xf32>
    %5 = arith.subf %3, %4 : vector<16x128xf32>
    %c1_i32 = arith.constant 1 : i32
    %6 = arith.muli %arg0, %c1_i32 : i32
    %7 = arith.addi %6, %arg1 : i32
    %8 = tpu.iota {dimensions = array<i32: 0>} : vector<16x128xi32>
    %c16_i32 = arith.constant 16 : i32
    %9 = arith.muli %7, %c16_i32 : i32
    %10 = vector.broadcast %9 : i32 to vector<16x128xi32>
    %11 = arith.addi %8, %10 : vector<16x128xi32>
    %c12_i32 = arith.constant 12 : i32
    %12 = vector.broadcast %c12_i32 : i32 to vector<16x128xi32>
    %13 = arith.cmpi slt, %11, %12 : vector<16x128xi32>
    %cst = arith.constant 0.000000e+00 : f32
    %14 = vector.broadcast %cst : f32 to vector<16x128xf32>
    %15 = arith.select %13, %5, %14 : vector<16x128xi1>, vector<16x128xf32>
    %16 = vector.shape_cast %15 : vector<16x128xf32> to vector<2x8x128xf32>
    %c0_4 = arith.constant 0 : index
    %c0_5 = arith.constant 0 : index
    %17 = vector.load %arg4[%c0_4, %c0_5] : memref<8x128xf32, #tpu.memory_space<vmem>>, vector<8x128xf32>
    %18 = math.absf %16 : vector<2x8x128xf32>
    %cst_6 = arith.constant dense<0.000000e+00> : vector<8x128xf32>
    %19 = vector.multi_reduction <add>, %18, %cst_6 [0] : vector<2x8x128xf32> to vector<8x128xf32>
    %20 = arith.addf %17, %19 : vector<8x128xf32>
    %c0_7 = arith.constant 0 : index
    %c0_8 = arith.constant 0 : index
    %21 = vector.load %arg4[%c0_7, %c0_8] : memref<8x128xf32, #tpu.memory_space<vmem>>, vector<8x128xf32>
    tpu.vector_store %arg4[%c0_7, %c0_8], %20 {strides = array<i32>} : memref<8x128xf32, #tpu.memory_space<vmem>>, vector<8x128xf32>,
    %c0_9 = arith.constant 0 : index
    %c0_10 = arith.constant 0 : index
    %22 = vector.load %arg5[%c0_9, %c0_10] : memref<8x128xf32, #tpu.memory_space<vmem>>, vector<8x128xf32>
    %23 = arith.mulf %16, %16 : vector<2x8x128xf32>
    %cst_11 = arith.constant dense<0.000000e+00> : vector<8x128xf32>
    %24 = vector.multi_reduction <add>, %23, %cst_11 [0] : vector<2x8x128xf32> to vector<8x128xf32>
    %25 = arith.addf %22, %24 : vector<8x128xf32>
    %c0_12 = arith.constant 0 : index
    %c0_13 = arith.constant 0 : index
    %26 = vector.load %arg5[%c0_12, %c0_13] : memref<8x128xf32, #tpu.memory_space<vmem>>, vector<8x128xf32>
    tpu.vector_store %arg5[%c0_12, %c0_13], %25 {strides = array<i32>} : memref<8x128xf32, #tpu.memory_space<vmem>>, vector<8x128xf32>,
    return
  }
  func.func @transform_0(%arg0: i32, %arg1: i32) -> (i32, i32) {
    %c1_i32 = arith.constant 1 : i32
    %0 = arith.muli %arg0, %c1_i32 : i32
    %1 = arith.addi %0, %arg1 : i32
    %c0_i32 = arith.constant 0 : i32
    %c0_i32_0 = arith.constant 0 : i32
    return %1, %c0_i32 : i32, i32
  }
  func.func @transform_1(%arg0: i32, %arg1: i32) -> (i32, i32) {
    %c1_i32 = arith.constant 1 : i32
    %0 = arith.muli %arg0, %c1_i32 : i32
    %1 = arith.addi %0, %arg1 : i32
    %c0_i32 = arith.constant 0 : i32
    %c0_i32_0 = arith.constant 0 : i32
    return %1, %c0_i32 : i32, i32
  }
  func.func @transform_2(%arg0: i32, %arg1: i32) -> (i32, i32) {
    %c0_i32 = arith.constant 0 : i32
    %c0_i32_0 = arith.constant 0 : i32
    return %arg0, %c0_i32 : i32, i32
  }
  func.func @transform_3(%arg0: i32, %arg1: i32) -> (i32, i32) {
    %c0_i32 = arith.constant 0 : i32
    %c0_i32_0 = arith.constant 0 : i32
    return %arg0, %c0_i32 : i32, i32
  }
}

</mosaic_0001>

<bundles_post_ra>
// kernel: tpu_custom_call.1
= control target key start
LH: loop header
LB: loop body
LE: loop exit
PB: predicated region body
PF: predicated region fallthrough
CT: control target
= control target key end

     0   :  { %9 = vsyncpa [#allocation3], 0  ;;  %s254_s0 = inlined_call_operand.hbm [shape: f32[12,128], index: 0, kind: input, shape index: {}]   ;;  %s255_s1 = inlined_call_operand.hbm [shape: f32[12,128], index: 1, kind: input, shape index: {}]   ;;  %s256_s2 = inlined_call_operand.hbm [shape: f32[8,128], index: 2, kind: output, shape index: {0}]   ;;  %s257_s3 = inlined_call_operand.hbm [shape: f32[8,128], index: 3, kind: output, shape index: {1}]  }
   0x1   :  { %10 = vsyncpa [#allocation6], 0 }
   0x2   :  { %11 = vsyncpa [#allocation4], 0 }
   0x3   :  { %12 = vsyncpa [#allocation9], 0  ;;  %s216_s12 = smov [#allocation2]  }
   0x4   :  { %s22_s13 = sshll.u32 %s216_s12, 4  ;;  %s23_s13 = int_to_ptr.vmem [resolvable:$true] %s22_s13 }
   0x5   :  { %s136_s14 = scalar_lea.vmem %s23_s13, 256  ;;  %p141_p1 = scmp.lt.s32.totalorder %s23_s13, %s23_s13 }
   0x6   :  { %p137_p0 = scmp.ne.s32.totalorder %s23_s13, %s136_s14  ;;  %p142_p2 = scmp.lt.s32.totalorder %s136_s14, %s136_s14 }
   0x8   :  { %p143_p3 = por %p142_p2, %p141_p1 }
   0xa   :  { %p144_p4 = pnand %p143_p3, %p137_p0 }
   0xc   :  { %147 = shalt.err (!%p144_p4)
}
   0xd   :  { %s217_s15 = smov 128   ;;  %s218_s16 = smov 8  }
   0xe   :  { %28 = dma.hbm_to_vmem [thread:$0]  %s254_s0, 256, %s23_s13, [#allocation3], %s217_s15, %s217_s15, %s218_s16  }
   0xf   :  { %s219_s19 = smov [#allocation5]  }
  0x10   :  { %s38_s20 = sshll.u32 %s219_s19, 4  ;;  %s39_s20 = int_to_ptr.vmem [resolvable:$true] %s38_s20 }
  0x11   :  { %s156_s21 = scalar_lea.vmem %s39_s20, 256  ;;  %p161_p6 = scmp.lt.s32.totalorder %s39_s20, %s39_s20 }
  0x12   :  { %p157_p5 = scmp.ne.s32.totalorder %s39_s20, %s156_s21  ;;  %p162_p7 = scmp.lt.s32.totalorder %s156_s21, %s156_s21 }
  0x14   :  { %p163_p8 = por %p162_p7, %p161_p6 }
  0x16   :  { %p164_p9 = pnand %p163_p8, %p157_p5 }
  0x18   :  { %167 = shalt.err (!%p164_p9)
}
  0x19   :  { %44 = dma.hbm_to_vmem [thread:$0]  %s255_s1, 256, %s39_s20, [#allocation6], %s217_s15, %s217_s15, %s218_s16  }
  0x1a   :  { %208 = dma.done.wait [#allocation3], 256  }
  0x1b   :  { %209 = vsyncadd [#allocation3], 4294967040 }
  0x1c   :  { %210 = dma.done.wait [#allocation6], 256  }
  0x1d   :  { %211 = vsyncadd [#allocation6], 4294967040  ;;  %v68_v0 = vlaneseq  ;;  %v61_v3 = vld [vmem:[#allocation5] sm:$0xff]  ;;  %v62_v4 = vld [vmem:[#allocation5 + $0x8] sm:$0xff]  ;;  %s220_s0 = smov [#allocation7]   ;;  %s221_s24 = smov [#allocation8]  }
  0x1e   :  { %v63_v5 = vld [vmem:[#allocation2] sm:$0xff]  ;;  %v64_v6 = vld [vmem:[#allocation2 + $0x8] sm:$0xff]  ;;  %s97_s1 = sshll.u32 %s220_s0, 4  ;;  %s107_s25 = sshll.u32 %s221_s24, 4  ;;  %s98_s1 = int_to_ptr.vmem [resolvable:$true] %s97_s1  ;;  %s108_s25 = int_to_ptr.vmem [resolvable:$true] %s107_s25 }
  0x1f   :  { %v69_v1 = vshrl.u32 %v68_v0, 7  ;;  %v65_v7 = vsub.f32 %v61_v3, %v63_v5  ;;  %v66_v8 = vsub.f32 %v62_v4, %v64_v6  ;;  %s168_s26 = scalar_lea.vmem %s98_s1, 128  ;;  %p173_p11 = scmp.lt.s32.totalorder %s98_s1, %s98_s1 }
  0x20   :  { %p169_p10 = scmp.ne.s32.totalorder %s98_s1, %s168_s26  ;;  %p174_p12 = scmp.lt.s32.totalorder %s168_s26, %s168_s26 }
  0x21   :  { %v70_v2 = vadd.s32 8, %v69_v1  ;;  %v80_v9 = vand.u32 2147483647, %v65_v7  ;;  %v86_v10 = vmul.f32 %v65_v7, %v65_v7 }
  0x22   :  { %p175_p13 = por %p174_p12, %p173_p11 }
  0x23   :  { %vm76_vm0 = vcmp.lt.s32.totalorder %v70_v2, 12 }
  0x24   :  { %v78_v11 = vsel %vm76_vm0, %v66_v8, 0.0  ;;  %p176_p0 = pnand %p175_p13, %p169_p10 }
  0x25   :  { %v81_v12 = vand.u32 2147483647, %v78_v11  ;;  %v87_v13 = vmul.f32 %v78_v11, %v78_v11 }
  0x27   :  { %v82_v14 = vadd.f32 %v81_v12, %v80_v9  ;;  %v88_v15 = vadd.f32 %v87_v13, %v86_v10 }
  0x29   :  { %84 = vst [vmem:[#allocation7] sm:$0xff] %v82_v14  ;;  %90 = vst [vmem:[#allocation8] sm:$0xff] %v88_v15 }
  0x2a   :  { %179 = shalt.err (!%p176_p0)
}
  0x2b   :  { %100 = dma.vmem_to_hbm [thread:$0]  %s98_s1, 128, %s256_s2, [#allocation4]  }
  0x2c   :  { %s188_s29 = scalar_lea.vmem %s108_s25, 128  ;;  %p193_p2 = scmp.lt.s32.totalorder %s108_s25, %s108_s25 }
  0x2d   :  { %p189_p1 = scmp.ne.s32.totalorder %s108_s25, %s188_s29  ;;  %p194_p3 = scmp.lt.s32.totalorder %s188_s29, %s188_s29 }
  0x2f   :  { %p195_p4 = por %p194_p3, %p193_p2 }
  0x31   :  { %p196_p5 = pnand %p195_p4, %p189_p1 }
  0x33   :  { %199 = shalt.err (!%p196_p5)
}
  0x34   :  { %110 = dma.vmem_to_hbm [thread:$0]  %s108_s25, 128, %s257_s3, [#allocation9]  }
  0x35   :  { %212 = dma.done.wait [#allocation4], 128  }
  0x36   :  { %213 = vsyncadd [#allocation4], 4294967168 }
  0x37   :  { %214 = dma.done.wait [#allocation9], 128  }
  0x38   :  { %215 = vsyncadd [#allocation9], 4294967168 }
  0x39   :  { %117 = vsyncpa [#allocation3], 1 }
  0x3a   :  { %118 = vsyncpa [#allocation6], 1 }
  0x3b   :  { %119 = vsyncpa [#allocation4], 1 }
  0x3c   :  { %120 = vsyncpa [#allocation9], 1 }

</bundles_post_ra>
